<compile_context>
chip_gen: v7x
topology: tpu7x:2x2x1
jax: 0.10.0
libtpu: 0.0.40
codegen_flags: <defaults>
</compile_context>

<pallas_src>
import functools

import jax
import jax.numpy as jnp
from jax.experimental import pallas as pl
from jax.experimental.pallas import tpu as pltpu


# ---------------------------------------------------------------------------
# Per-generation sizing (v5e/v6e: 128 MiB VMEM, v7x: 64 MiB per TensorCore).
# ---------------------------------------------------------------------------
def _query_vmem_capacity():
    try:
        info = pltpu.get_tpu_info()
        for attr in ("vmem_capacity_bytes", "vmem_size_bytes", "vmem_bytes"):
            v = getattr(info, attr, None)
            if v:
                return int(v)
    except Exception:
        pass
    return 64 * 1024 * 1024  # conservative default (v7x per-core VMEM)


_VMEM_CAP = _query_vmem_capacity()
# Leave headroom for compiler scratch; cap at ~100 MiB on 128 MiB parts.
_VMEM_LIMIT_BYTES = max(32 * 2**20, min(_VMEM_CAP - 16 * 2**20, 100 * 2**20))
_BIG_VMEM = _VMEM_CAP >= 96 * 2**20
_TM_CANDS = (1024, 512, 256, 128) if _BIG_VMEM else (512, 256, 128)
_TN_CANDS = (1024, 512, 256, 128) if _BIG_VMEM else (512, 256, 128)


def _round_up(x, m):
    return (x + m - 1) // m * m


def _pad_rows(x, m_pad):
    if x.shape[0] == m_pad:
        return x
    return jnp.pad(x, ((0, m_pad - x.shape[0]), (0, 0)))


def _cparams(sem):
    return pltpu.CompilerParams(
        dimension_semantics=sem, vmem_limit_bytes=_VMEM_LIMIT_BYTES)


def _pick_n_tile(n):
    for t in _TN_CANDS:
        if n % t == 0:
            return t
    return n  # non-128-multiple N: single full-dim block


def _mn_tiles(m, n, m_row_bytes, n_col_bytes, out_elt_bytes):
    """Pick (Mp, tm, tn) so double-buffered blocks fit comfortably in VMEM."""
    tn = _pick_n_tile(n)
    cap = int(_VMEM_LIMIT_BYTES * 0.6)
    for tm in _TM_CANDS:
        if tm > _round_up(m, 128):
            continue
        blk = 2 * (tm * m_row_bytes + tn * n_col_bytes + tm * tn * out_elt_bytes)
        if blk <= cap:
            return _round_up(m, tm), tm, tn
    return _round_up(m, 128), 128, tn


def _pick_row_block(ho, wp, nout, budget=512 * 1024):
    """Largest output-row block dividing Ho whose f32 accumulator stays small."""
    for r in (8, 7, 4, 2, 1):
        if ho % r == 0 and r * wp * nout * 4 <= budget:
            return r
    return 1


# ---------------------------------------------------------------------------
# Pallas kernels
# ---------------------------------------------------------------------------
def _matmul_bias_kernel(x_ref, w_ref, b_ref, o_ref, *, relu):
    """out = maybe_relu(x @ w + bias)   (BN scale already folded into w)."""
    acc = jnp.dot(x_ref[...], w_ref[...], preferred_element_type=jnp.float32)
    y = acc + b_ref[...]
    if relu:
        y = jnp.maximum(y, 0.0)
    o_ref[...] = y.astype(o_ref.dtype)


def _dual_matmul_bias_relu_kernel(a_ref, wa_ref, b_ref, wb_ref, bias_ref, o_ref):
    """out = relu(a @ wa + b @ wb + bias)  — fused conv3 + projection shortcut."""
    acc = jnp.dot(a_ref[...], wa_ref[...], preferred_element_type=jnp.float32)
    acc = acc + jnp.dot(b_ref[...], wb_ref[...], preferred_element_type=jnp.float32)
    y = acc + bias_ref[...]
    o_ref[...] = jnp.maximum(y, 0.0).astype(o_ref.dtype)


def _matmul_bias_res_relu_kernel(a_ref, wa_ref, bias_ref, res_ref, o_ref):
    """out = relu(a @ wa + bias + residual)  — conv3 + identity shortcut (bf16 res)."""
    acc = jnp.dot(a_ref[...], wa_ref[...], preferred_element_type=jnp.float32)
    y = acc + bias_ref[...] + res_ref[...].astype(jnp.float32)
    o_ref[...] = jnp.maximum(y, 0.0).astype(o_ref.dtype)


def _conv3x3_bias_relu_kernel(x_ref, w_ref, b_ref, o_ref, *, stride,
                              rows_per_blk, w_out):
    """3x3 conv + bias + relu on one block of R output rows.

    x_ref : (1, Hp, Wp, C)   zero-padded image (VMEM-resident, revisited per rb)
    w_ref : (3, 3*C, Nout)   kh-major weights, kw taps stacked along K
    b_ref : (1, Nout) f32
    o_ref : (1, R, Wo, Nout)

    For each kh the R full-width rows are flattened contiguously to (R*Wp, C)
    (Wp is a multiple of 16), the kw=1,2 shifts are cheap sublane-offset copies
    whose wrapped tails only touch columns that are sliced away, and one matmul
    with K = 3*C accumulates the whole kh row of taps.
    """
    Wp, C = x_ref.shape[2], x_ref.shape[3]
    Nout = w_ref.shape[2]
    R = rows_per_blk
    n = R * Wp
    rb = pl.program_id(1)
    row0 = pl.multiple_of(rb * (R * stride), R * stride)

    if stride == 1:
        row_sets = [x_ref[0, pl.ds(row0 + kh, R), :, :] for kh in range(3)]
    else:  # stride == 2: rows row0 + 2r + kh, via a parity split (no strided slices)
        nrows = 2 * (R - 1) + 3
        win = x_ref[0, pl.ds(row0, nrows), :, :]            # (2R+1, Wp, C)
        pairs = win[:2 * R].reshape(R, 2, Wp, C)            # leading-dim split
        even, odd = pairs[:, 0], pairs[:, 1]
        last = win[2 * R:2 * R + 1]
        if R == 1:
            kh2 = last
        else:
            kh2 = jnp.concatenate([even[1:], last], axis=0)
        row_sets = [even, odd, kh2]

    acc = jnp.zeros((n, Nout), jnp.float32)
    for kh in range(3):
        flat = row_sets[kh].reshape(n, C)                   # contiguous merge
        parts = [flat]
        for kw in (1, 2):
            # shifted[i] = flat[i + kw]; wrapped tail only feeds discarded columns.
            parts.append(jnp.concatenate([flat[kw:], flat[:kw]], axis=0))
        stacked = jnp.concatenate(parts, axis=-1)           # (n, 3C) — K >= 256
        acc = acc + jnp.dot(stacked, w_ref[kh],
                            preferred_element_type=jnp.float32)

    y = acc.reshape(R, Wp, Nout)
    if stride == 1:
        y = y[:, :w_out, :]
    else:
        y = y[:, :stride * w_out, :].reshape(R, w_out, stride, Nout)[:, :, 0, :]
    y = jnp.maximum(y + b_ref[...].reshape(1, 1, Nout), 0.0)
    o_ref[...] = y.reshape(1, R, w_out, Nout).astype(o_ref.dtype)


# ---------------------------------------------------------------------------
# pallas_call wrappers
# ---------------------------------------------------------------------------
def matmul_bias(x, w, bias, *, relu, out_dtype):
    """x:[M,K] bf16, w:[K,N] bf16 (BN-scaled), bias:[1,N] f32 -> [M,N]."""
    M, K = x.shape
    Np = w.shape[1]
    Mp, tm, tn = _mn_tiles(M, Np, 2 * K, 2 * K + 4, 2)
    x = _pad_rows(x, Mp)
    out = pl.pallas_call(
        functools.partial(_matmul_bias_kernel, relu=relu),
        out_shape=jax.ShapeDtypeStruct((Mp, Np), out_dtype),
        grid_spec=pltpu.PrefetchScalarGridSpec(
            num_scalar_prefetch=0,
            grid=(Mp // tm, Np // tn),
            in_specs=[
                pl.BlockSpec((tm, K), lambda i, j: (i, 0)),
                pl.BlockSpec((K, tn), lambda i, j: (0, j)),
                pl.BlockSpec((1, tn), lambda i, j: (0, j)),
            ],
            out_specs=pl.BlockSpec((tm, tn), lambda i, j: (i, j)),
        ),
        compiler_params=_cparams(("parallel", "parallel")),
    )(x, w, bias)
    return out[:M] if Mp != M else out


def dual_matmul_bias_relu(a, wa, b, wb, bias, *, out_dtype):
    """relu(a@wa + b@wb + bias); a:[M,Ka], b:[M,Kb], wa:[Ka,N], wb:[Kb,N]."""
    M, Ka = a.shape
    Kb = b.shape[1]
    Np = wa.shape[1]
    Mp, tm, tn = _mn_tiles(M, Np, 2 * (Ka + Kb), 2 * (Ka + Kb) + 4, 2)
    a, b = _pad_rows(a, Mp), _pad_rows(b, Mp)
    out = pl.pallas_call(
        _dual_matmul_bias_relu_kernel,
        out_shape=jax.ShapeDtypeStruct((Mp, Np), out_dtype),
        grid_spec=pltpu.PrefetchScalarGridSpec(
            num_scalar_prefetch=0,
            grid=(Mp // tm, Np // tn),
            in_specs=[
                pl.BlockSpec((tm, Ka), lambda i, j: (i, 0)),
                pl.BlockSpec((Ka, tn), lambda i, j: (0, j)),
                pl.BlockSpec((tm, Kb), lambda i, j: (i, 0)),
                pl.BlockSpec((Kb, tn), lambda i, j: (0, j)),
                pl.BlockSpec((1, tn), lambda i, j: (0, j)),
            ],
            out_specs=pl.BlockSpec((tm, tn), lambda i, j: (i, j)),
        ),
        compiler_params=_cparams(("parallel", "parallel")),
    )(a, wa, b, wb, bias)
    return out[:M] if Mp != M else out


def matmul_bias_residual_relu(a, wa, bias, res, *, out_dtype):
    """relu(a@wa + bias + res); a:[M,K], wa:[K,N], res:[M,N] bf16 (identity)."""
    M, K = a.shape
    Np = wa.shape[1]
    Mp, tm, tn = _mn_tiles(M, Np, 2 * K, 2 * K + 4, 4)
    a, res = _pad_rows(a, Mp), _pad_rows(res, Mp)
    out = pl.pallas_call(
        _matmul_bias_res_relu_kernel,
        out_shape=jax.ShapeDtypeStruct((Mp, Np), out_dtype),
        grid_spec=pltpu.PrefetchScalarGridSpec(
            num_scalar_prefetch=0,
            grid=(Mp // tm, Np // tn),
            in_specs=[
                pl.BlockSpec((tm, K), lambda i, j: (i, 0)),
                pl.BlockSpec((K, tn), lambda i, j: (0, j)),
                pl.BlockSpec((1, tn), lambda i, j: (0, j)),
                pl.BlockSpec((tm, tn), lambda i, j: (i, j)),
            ],
            out_specs=pl.BlockSpec((tm, tn), lambda i, j: (i, j)),
        ),
        compiler_params=_cparams(("parallel", "parallel")),
    )(a, wa, bias, res)
    return out[:M] if Mp != M else out


def conv3x3_bn_relu(x_nhwc, w_k, bias, *, stride, out_dtype):
    """x:[N,H,W,C] bf16 (C mult of 128), w_k:[3, 3C, Nout] bf16 (BN-scaled),
       bias:[1,Nout] f32 -> [N,Ho,Wo,Nout]."""
    assert stride in (1, 2), "ResNet Bottleneck only uses stride 1 or 2"
    N, H, W, C = x_nhwc.shape
    Nout = w_k.shape[-1]
    Ho = (H - 1) // stride + 1
    Wo = (W - 1) // stride + 1
    Hp = H + 2
    # Pad width to a multiple of 16 (bf16 sublane granule) so the in-kernel
    # (R, Wp, C) -> (R*Wp, C) merges are tile-aligned (no relayout copies).
    Wp = _round_up(W + 2, 16)
    xp = jnp.pad(x_nhwc, ((0, 0), (1, 1), (1, Wp - W - 1), (0, 0)))
    R = _pick_row_block(Ho, Wp, Nout)
    kernel = functools.partial(_conv3x3_bias_relu_kernel,
                               stride=stride, rows_per_blk=R, w_out=Wo)
    return pl.pallas_call(
        kernel,
        out_shape=jax.ShapeDtypeStruct((N, Ho, Wo, Nout), out_dtype),
        grid_spec=pltpu.PrefetchScalarGridSpec(
            num_scalar_prefetch=0,
            grid=(N, Ho // R),
            in_specs=[
                # whole padded image; block index constant over rb -> fetched once
                pl.BlockSpec((1, Hp, Wp, C), lambda n, r: (n, 0, 0, 0)),
                pl.BlockSpec(w_k.shape, lambda n, r: (0, 0, 0)),
                pl.BlockSpec((1, Nout), lambda n, r: (0, 0)),
            ],
            out_specs=pl.BlockSpec((1, R, Wo, Nout), lambda n, r: (n, r, 0, 0)),
        ),
        compiler_params=_cparams(("parallel", "parallel")),
    )(xp, w_k, bias)


# ---------------------------------------------------------------------------
# BN folding, parameter init
# ---------------------------------------------------------------------------
def fold_bn(gamma, beta, mean, var, eps=1e-5):
    scale = gamma / jnp.sqrt(var + eps)
    bias = beta - mean * scale
    return scale, bias


def fold_bn_into_weight(w_io, gamma, beta, mean, var, eps=1e-5):
    """w_io:[K_in, C_out] -> (w * scale, bias[1, C_out]) with BN folded in."""
    scale, bias = fold_bn(gamma, beta, mean, var, eps)
    return w_io * scale[None, :], bias.reshape(1, -1)


def init_bottleneck_params(key, in_planes, planes, stride, expansion=4):
    ks = jax.random.split(key, 16)
    p = {}

    def conv_w(k, cout, cin, kh, kw):
        return jax.random.normal(k, (cout, cin, kh, kw), jnp.float32) * 0.1

    def bn(k1, k2, k3, k4, c):
        gamma = jax.random.uniform(k1, (c,), jnp.float32, 0.5, 1.5)
        beta = jax.random.normal(k2, (c,), jnp.float32) * 0.1
        mean = jax.random.normal(k3, (c,), jnp.float32) * 0.1
        var = jax.random.uniform(k4, (c,), jnp.float32, 0.5, 1.5)
        return gamma, beta, mean, var

    p["w1"] = conv_w(ks[0], planes, in_planes, 1, 1)
    p["bn1"] = bn(ks[1], ks[2], ks[3], ks[4], planes)
    p["w2"] = conv_w(ks[5], planes, planes, 3, 3)
    p["bn2"] = bn(ks[6], ks[7], ks[8], ks[9], planes)
    p["w3"] = conv_w(ks[10], expansion * planes, planes, 1, 1)
    p["bn3"] = bn(ks[11], ks[12], ks[13], ks[14], expansion * planes)
    p["has_shortcut"] = (stride != 1) or (in_planes != expansion * planes)
    if p["has_shortcut"]:
        ks2 = jax.random.split(ks[15], 5)
        p["ws"] = conv_w(ks2[0], expansion * planes, in_planes, 1, 1)
        p["bns"] = bn(ks2[1], ks2[2], ks2[3], ks2[4], expansion * planes)
    return p


# ---------------------------------------------------------------------------
# Bottleneck forward (Pallas kernels on the hot path)
# ---------------------------------------------------------------------------
def bottleneck_forward(x_nchw, params, stride):
    # NCHW -> NHWC once; the bf16 cast fuses into the same transpose pass.
    xb = jnp.transpose(x_nchw, (0, 2, 3, 1)).astype(jnp.bfloat16)
    N, H, W, Cin = xb.shape
    planes = params["w2"].shape[0]
    cout = params["w3"].shape[0]                                   # 4 * planes

    # Pad only the *internal* channel dims (conv outputs) to multiples of 128
    # for lane-dense stores; input channels are consumed as a full-K block.
    P_p = _round_up(planes, 128)
    Co_p = _round_up(cout, 128)

    # ---- fold BN into weights, pad output channels, cast to bf16 ----------
    w1 = params["w1"][:, :, 0, 0].T                                # [Cin, planes]
    w1, b1 = fold_bn_into_weight(w1, *params["bn1"])
    w1 = jnp.pad(w1, ((0, 0), (0, P_p - planes))).astype(jnp.bfloat16)
    b1 = jnp.pad(b1, ((0, 0), (0, P_p - planes)))

    w2 = jnp.transpose(params["w2"], (2, 3, 1, 0)).reshape(9 * planes, planes)
    w2, b2 = fold_bn_into_weight(w2, *params["bn2"])
    w2 = w2.reshape(3, 3, planes, planes)
    w2 = jnp.pad(w2, ((0, 0), (0, 0), (0, P_p - planes), (0, P_p - planes)))
    w2 = w2.reshape(3, 3 * P_p, P_p).astype(jnp.bfloat16)          # kw stacked on K
    b2 = jnp.pad(b2, ((0, 0), (0, P_p - planes)))

    w3 = params["w3"][:, :, 0, 0].T                                # [planes, 4p]
    w3, b3 = fold_bn_into_weight(w3, *params["bn3"])
    w3 = jnp.pad(w3, ((0, P_p - planes), (0, Co_p - cout))).astype(jnp.bfloat16)
    b3 = jnp.pad(b3, ((0, 0), (0, Co_p - cout)))

    # ---- conv1 (1x1) + bn1 + relu ------------------------------------------
    M = N * H * W
    out1 = matmul_bias(xb.reshape(M, Cin), w1, b1, relu=True,
                       out_dtype=jnp.bfloat16)
    out1 = out1.reshape(N, H, W, P_p)

    # ---- conv2 (3x3, stride, pad=1) + bn2 + relu — row-tiled, K-stacked ----
    out2 = conv3x3_bn_relu(out1, w2, b2, stride=stride, out_dtype=jnp.bfloat16)
    _, Ho, Wo, _ = out2.shape
    out2_flat = out2.reshape(N * Ho * Wo, P_p)

    # ---- conv3 (1x1) + bn3 fused with shortcut + residual add + relu -------
    if params["has_shortcut"]:
        ws = params["ws"][:, :, 0, 0].T                            # [Cin, 4p]
        ws, bs = fold_bn_into_weight(ws, *params["bns"])
        ws = jnp.pad(ws, ((0, 0), (0, Co_p - cout))).astype(jnp.bfloat16)
        bs = jnp.pad(bs, ((0, 0), (0, Co_p - cout)))
        # TODO(synk): fold stride-2 decimation into the kernel index_map / DMA
        #             instead of this XLA strided-slice pass.
        xs = xb if stride == 1 else xb[:, ::stride, ::stride, :]
        out3 = dual_matmul_bias_relu(out2_flat, w3,
                                     xs.reshape(N * Ho * Wo, Cin),
                                     ws, b3 + bs, out_dtype=jnp.bfloat16)
    else:
        # identity shortcut (stride == 1, Cin == 4*planes): bf16 residual
        res = xb.reshape(N * Ho * Wo, Cin)
        if Co_p != cout:      # toy shapes only; real ResNet couts are 128-mults
            res = jnp.pad(res, ((0, 0), (0, Co_p - cout)))
        out3 = matmul_bias_residual_relu(out2_flat, w3, b3, res,
                                         out_dtype=jnp.bfloat16)

    out = out3.reshape(N, Ho, Wo, Co_p)
    if Co_p != cout:
        out = out[..., :cout]
    # NHWC -> NCHW once at the module boundary (a full ResNet would stay NHWC).
    return jnp.transpose(out, (0, 3, 1, 2)).astype(jnp.float32)


# ---------------------------------------------------------------------------
# Pure-jnp f32 reference (same math, no Pallas) for the correctness check.
# ---------------------------------------------------------------------------
def _im2col_3x3(x_nhwc, stride):
    N, H, W, C = x_nhwc.shape
    xp = jnp.pad(x_nhwc, ((0, 0), (1, 1), (1, 1), (0, 0)))
    Ho = (H + 2 - 3) // stride + 1
    Wo = (W + 2 - 3) // stride + 1
    cols = []
    for kh in range(3):
        for kw in range(3):
            cols.append(xp[:, kh:kh + stride * Ho:stride,
                           kw:kw + stride * Wo:stride, :])
    col = jnp.concatenate(cols, axis=-1)
    return col.reshape(N * Ho * Wo, 9 * C), Ho, Wo


def bottleneck_reference(x_nchw, params, stride):
    x = jnp.transpose(x_nchw, (0, 2, 3, 1)).astype(jnp.float32)
    N, H, W, Cin = x.shape
    w1 = params["w1"][:, :, 0, 0].T
    planes = w1.shape[1]
    s1, b1 = fold_bn(*params["bn1"])
    out1 = jnp.maximum(x.reshape(-1, Cin) @ w1 * s1 + b1, 0.0).reshape(N, H, W, planes)
    x_col, Ho, Wo = _im2col_3x3(out1, stride)
    w2 = jnp.transpose(params["w2"], (2, 3, 1, 0)).reshape(9 * planes, planes)
    s2, b2 = fold_bn(*params["bn2"])
    out2 = jnp.maximum(x_col @ w2 * s2 + b2, 0.0)
    x_s = x[:, ::stride, ::stride, :].reshape(N * Ho * Wo, Cin)
    if params["has_shortcut"]:
        ws = params["ws"][:, :, 0, 0].T
        ss, bs = fold_bn(*params["bns"])
        sc = x_s @ ws * ss + bs
    else:
        sc = x_s
    w3 = params["w3"][:, :, 0, 0].T
    s3, b3 = fold_bn(*params["bn3"])
    out3 = jnp.maximum(out2 @ w3 * s3 + b3 + sc, 0.0)
    cout = params["w3"].shape[0]
    return jnp.transpose(out3.reshape(N, Ho, Wo, cout), (0, 3, 1, 2))


if __name__ == "__main__":
    key = jax.random.PRNGKey(0)
    k_x, k_p, k_x2, k_p2, k_x3, k_p3 = jax.random.split(key, 6)

    def check(x, params, stride, expect_shape, tag):
        out = jax.block_until_ready(bottleneck_forward(x, params, stride))
        ref = jax.block_until_ready(bottleneck_reference(x, params, stride))
        assert out.shape == expect_shape, (tag, out.shape)
        # bf16 MXU inputs with f32 accumulation -> loosened tolerance vs f32 ref.
        assert jnp.allclose(out, ref, rtol=2e-2, atol=2e-2), \
            f"{tag}: mismatch (max abs err {jnp.max(jnp.abs(out - ref)):.3e})"

    # Config 1: projection shortcut (in_planes != 4*planes), stride=1.
    in_planes, planes, stride = 4, 4, 1
    x = jax.random.normal(k_x, (2, in_planes, 16, 16), jnp.float32)   # NCHW
    params = init_bottleneck_params(k_p, in_planes, planes, stride)
    check(x, params, stride, (2, 4 * planes, 16, 16), "proj/stride1")

    # Config 2: identity shortcut (in_planes == 4*planes), stride=1.
    in_planes2, planes2, stride2 = 16, 4, 1
    x2 = jax.random.normal(k_x2, (2, in_planes2, 16, 16), jnp.float32)
    params2 = init_bottleneck_params(k_p2, in_planes2, planes2, stride2)
    check(x2, params2, stride2, (2, 4 * planes2, 16, 16), "identity/stride1")

    # Config 3: downsampling block (projection shortcut, stride=2).
    in_planes3, planes3, stride3 = 8, 4, 2
    x3 = jax.random.normal(k_x3, (2, in_planes3, 16, 16), jnp.float32)
    params3 = init_bottleneck_params(k_p3, in_planes3, planes3, stride3)
    check(x3, params3, stride3, (2, 4 * planes3, 8, 8), "proj/stride2")

    print("KERNEL_OK")
</pallas_src>

<mosaic_0001>
module attributes {stable_mosaic.version = 11 : i64} {
  func.func @_matmul_bias_kernel(%arg0: i32, %arg1: i32, %arg2: memref<512x4xbf16, #tpu.memory_space<vmem>>, %arg3: memref<4x128xbf16, #tpu.memory_space<vmem>>, %arg4: memref<1x128xf32, #tpu.memory_space<vmem>>, %arg5: memref<512x128xbf16, #tpu.memory_space<vmem>>) attributes {dimension_semantics = [#tpu.dimension_semantics<parallel>, #tpu.dimension_semantics<parallel>], iteration_bounds = array<i64: 1, 1>, scalar_prefetch = 0 : i64, scratch_operands = 0 : i64, tpu.core_type = #tpu.core_type<tc>, window_params = [{transform_indices = @transform_0, window_bounds = array<i64: 512, 4>}, {transform_indices = @transform_1, window_bounds = array<i64: 4, 128>}, {transform_indices = @transform_2, window_bounds = array<i64: 1, 128>}, {transform_indices = @transform_3, window_bounds = array<i64: 512, 128>}]} {
    %c0 = arith.constant 0 : index
    %c0_0 = arith.constant 0 : index
    %0 = vector.load %arg2[%c0, %c0_0] : memref<512x4xbf16, #tpu.memory_space<vmem>>, vector<512x4xbf16>
    %c0_1 = arith.constant 0 : index
    %c0_2 = arith.constant 0 : index
    %1 = vector.load %arg3[%c0_1, %c0_2] : memref<4x128xbf16, #tpu.memory_space<vmem>>, vector<4x128xbf16>
    %cst = arith.constant dense<0.000000e+00> : vector<512x128xf32>
    %2 = tpu.matmul %0, %1, %cst {dimension_numbers = #tpu.dot_dimension_numbers<[1], [0], [0], [1], [0, 0, 1, 1], [], []>} : vector<512x4xbf16>, vector<4x128xbf16>, vector<512x128xf32> -> vector<512x128xf32>
    %c0_3 = arith.constant 0 : index
    %c0_4 = arith.constant 0 : index
    %3 = vector.load %arg4[%c0_3, %c0_4] : memref<1x128xf32, #tpu.memory_space<vmem>>, vector<1x128xf32>
    %4 = vector.broadcast %3 : vector<1x128xf32> to vector<512x128xf32>
    %5 = arith.addf %2, %4 : vector<512x128xf32>
    %cst_5 = arith.constant 0.000000e+00 : f32
    %6 = vector.broadcast %cst_5 : f32 to vector<512x128xf32>
    %7 = arith.maximumf %5, %6 : vector<512x128xf32>
    %8 = arith.truncf %7 : vector<512x128xf32> to vector<512x128xbf16>
    %c0_6 = arith.constant 0 : index
    %c0_7 = arith.constant 0 : index
    %9 = vector.load %arg5[%c0_6, %c0_7] : memref<512x128xbf16, #tpu.memory_space<vmem>>, vector<512x128xbf16>
    tpu.vector_store %arg5[%c0_6, %c0_7], %8 {strides = array<i32>} : memref<512x128xbf16, #tpu.memory_space<vmem>>, vector<512x128xbf16>,
    return
  }
  func.func @transform_0(%arg0: i32, %arg1: i32) -> (i32, i32) {
    %c0_i32 = arith.constant 0 : i32
    %c0_i32_0 = arith.constant 0 : i32
    return %arg0, %c0_i32 : i32, i32
  }
  func.func @transform_1(%arg0: i32, %arg1: i32) -> (i32, i32) {
    %c0_i32 = arith.constant 0 : i32
    %c0_i32_0 = arith.constant 0 : i32
    return %c0_i32, %arg1 : i32, i32
  }
  func.func @transform_2(%arg0: i32, %arg1: i32) -> (i32, i32) {
    %c0_i32 = arith.constant 0 : i32
    %c0_i32_0 = arith.constant 0 : i32
    return %c0_i32, %arg1 : i32, i32
  }
  func.func @transform_3(%arg0: i32, %arg1: i32) -> (i32, i32) {
    %c0_i32 = arith.constant 0 : i32
    return %arg0, %arg1 : i32, i32
  }
}

</mosaic_0001>

<bundles_post_ra>
// kernel: tpu_custom_call.1
= control target key start
LH: loop header
LB: loop body
LE: loop exit
PB: predicated region body
PF: predicated region fallthrough
CT: control target
= control target key end

     0   :  { %vm345_vm0 = vcmask 1041408   ;;  %vm248_vm1 = vcmask 31744   ;;  %s1819_s0 = inlined_call_operand.vmem [shape: bf16[512,4], index: 0, kind: input, shape index: {}]   ;;  %s1820_s1 = inlined_call_operand.vmem [shape: bf16[4,128], index: 1, kind: input, shape index: {}]   ;;  %s1821_s2 = inlined_call_operand.vmem [shape: f32[1,128], index: 2, kind: input, shape index: {}]   ;;  %s1822_s3 = inlined_call_operand.hbm [shape: bf16[512,128], index: 3, kind: output, shape index: {}]  }
   0x1   :  { %v80_v0 = vld [vmem:[%s1820_s1] sm:$0x3]  ;;  %v1530_v4 = vld [vmem:[%s1819_s0 + $0x8] sm:$0xff]   ;;  %v1532_v6 = vld [vmem:[%s1819_s0 + $0x10] sm:$0xff]  }
   0x2   :  { %v1528_v1 = vld [vmem:[%s1819_s0] sm:$0xff]   ;;  %1523 = vmatprep.subr.msk.bf16.mxu0 %vm345_vm0, %v80_v0  ;;  %1524 = vmatprep.subr.msk.bf16.mxu1 %vm345_vm0, %v80_v0  ;;  %v347_v2 = vsel %vm345_vm0, %v80_v0, 0  ;;  %v1531_v5 = vld [vmem:[%s1819_s0 + $0x88] sm:$0xff]   ;;  %v1533_v7 = vld [vmem:[%s1819_s0 + $0x90] sm:$0xff]  }
   0x3   :  { %1456 = vmatpush3.bf16.msra.mxu0 %v347_v2  ;;  %1522 = vmatpush3.bf16.msra.mxu1 %v347_v2  ;;  %v1529_v3 = vld [vmem:[%s1819_s0 + $0x80] sm:$0xff]   ;;  %v1534_v8 = vld [vmem:[%s1819_s0 + $0x18] sm:$0xff]   ;;  %v1538_v12 = vld [vmem:[%s1819_s0 + $0x28] sm:$0xff]  }
   0x4   :  { %1457 = vmatprep.mubr.msk.bf16.mxu0 %vm248_vm1, %v1528_v1  ;;  %1489 = vmatprep.mubr.msk.bf16.mxu1 %vm248_vm1, %v1529_v3  ;;  %v1535_v9 = vld [vmem:[%s1819_s0 + $0x98] sm:$0xff]   ;;  %v1536_v10 = vld [vmem:[%s1819_s0 + $0x20] sm:$0xff]   ;;  %v1539_v13 = vld [vmem:[%s1819_s0 + $0xa8] sm:$0xff]  }
   0x5   :  { %v1537_v11 = vld [vmem:[%s1819_s0 + $0xa0] sm:$0xff]   ;;  %v1540_v14 = vld [vmem:[%s1819_s0 + $0x30] sm:$0xff]   ;;  %v1542_v16 = vld [vmem:[%s1819_s0 + $0x38] sm:$0xff]  }
   0x6   :  { %1458 = vmatmul.mubr.msk.bf16.vlgmr.msra.gmra.mrb[0].mxu0 %vm248_vm1, %v1530_v4  ;;  %1490 = vmatmul.mubr.msk.bf16.vlgmr.msra.gmra.mrb[0].mxu1 %vm248_vm1, %v1531_v5  ;;  %v1541_v15 = vld [vmem:[%s1819_s0 + $0xb0] sm:$0xff]   ;;  %v1543_v17 = vld [vmem:[%s1819_s0 + $0xb8] sm:$0xff]   ;;  %v1544_v18 = vld [vmem:[%s1819_s0 + $0x40] sm:$0xff]  }
   0x7   :  { %1461 = vmatprep.mubr.msk.bf16.mxu0 %vm248_vm1, %v1532_v6  ;;  %1493 = vmatprep.mubr.msk.bf16.mxu1 %vm248_vm1, %v1533_v7  ;;  %v1545_v19 = vld [vmem:[%s1819_s0 + $0xc0] sm:$0xff]  }
   0xe   :  { %1462 = vmatmul.mubr.msk.bf16.gmra.mrb[4].mxu0 %vm248_vm1, %v1534_v8  ;;  %1494 = vmatmul.mubr.msk.bf16.gmra.mrb[4].mxu1 %vm248_vm1, %v1535_v9 }
   0xf   :  { %1465 = vmatprep.mubr.msk.bf16.mxu0 %vm248_vm1, %v1536_v10  ;;  %1497 = vmatprep.mubr.msk.bf16.mxu1 %vm248_vm1, %v1537_v11 }
  0x16   :  { %1466 = vmatmul.mubr.msk.bf16.gmra.mrb[8].mxu0 %vm248_vm1, %v1538_v12  ;;  %1498 = vmatmul.mubr.msk.bf16.gmra.mrb[8].mxu1 %vm248_vm1, %v1539_v13 }
  0x17   :  { %1469 = vmatprep.mubr.msk.bf16.mxu0 %vm248_vm1, %v1540_v14  ;;  %1501 = vmatprep.mubr.msk.bf16.mxu1 %vm248_vm1, %v1541_v15 }
  0x1e   :  { %1470 = vmatmul.mubr.msk.bf16.gmra.mrb[12].mxu0 %vm248_vm1, %v1542_v16  ;;  %1502 = vmatmul.mubr.msk.bf16.gmra.mrb[12].mxu1 %vm248_vm1, %v1543_v17 }
  0x1f   :  { %1473 = vmatprep.mubr.msk.bf16.mxu0 %vm248_vm1, %v1544_v18  ;;  %1505 = vmatprep.mubr.msk.bf16.mxu1 %vm248_vm1, %v1545_v19 }
  0x20   :  { %8 = vsyncpa [#allocation3], 0  ;;  %v1546_v20 = vld [vmem:[%s1819_s0 + $0x48] sm:$0xff]   ;;  %v1548_v22 = vld [vmem:[%s1819_s0 + $0x50] sm:$0xff]  }
  0x21   :  { %v1547_v21 = vld [vmem:[%s1819_s0 + $0xc8] sm:$0xff]   ;;  %v1549_v23 = vld [vmem:[%s1819_s0 + $0xd0] sm:$0xff]   ;;  %v1550_v24 = vld [vmem:[%s1819_s0 + $0x58] sm:$0xff]  }
  0x22   :  { %v1551_v25 = vld [vmem:[%s1819_s0 + $0xd8] sm:$0xff]   ;;  %v1552_v26 = vld [vmem:[%s1819_s0 + $0x60] sm:$0xff]   ;;  %v1554_v28 = vld [vmem:[%s1819_s0 + $0x68] sm:$0xff]  }
  0x23   :  { %v1553_v27 = vld [vmem:[%s1819_s0 + $0xe0] sm:$0xff]   ;;  %v1555_v29 = vld [vmem:[%s1819_s0 + $0xe8] sm:$0xff]   ;;  %v1556_v30 = vld [vmem:[%s1819_s0 + $0x70] sm:$0xff]  }
  0x24   :  { %v1557_v31 = vld [vmem:[%s1819_s0 + $0xf0] sm:$0xff]   ;;  %v1558_v32 = vld [vmem:[%s1819_s0 + $0x78] sm:$0xff]   ;;  %v1741_v34 = vld [vmem:[%s1821_s2] ss:$0 sm:$0xff] }
  0x25   :  { %v1559_v33 = vld [vmem:[%s1819_s0 + $0xf8] sm:$0xff]   ;;  %s1584_s0 = smov [#allocation2]  }
  0x26   :  { %1474 = vmatmul.mubr.msk.bf16.gmra.mrb[16].mxu0 %vm248_vm1, %v1546_v20  ;;  %1506 = vmatmul.mubr.msk.bf16.gmra.mrb[16].mxu1 %vm248_vm1, %v1547_v21  ;;  %s1027_s2 = sshll.u32 %s1584_s0, 4  ;;  %s1028_s2 = int_to_ptr.vmem [resolvable:$true] %s1027_s2 }
  0x27   :  { %1477 = vmatprep.mubr.msk.bf16.mxu0 %vm248_vm1, %v1548_v22  ;;  %1509 = vmatprep.mubr.msk.bf16.mxu1 %vm248_vm1, %v1549_v23  ;;  %s1560_s23 = scalar_lea.vmem %s1028_s2, 4096  ;;  %p1565_p1 = scmp.lt.s32.totalorder %s1028_s2, %s1028_s2 }
  0x28   :  { %p1561_p0 = scmp.ne.s32.totalorder %s1028_s2, %s1560_s23  ;;  %p1566_p2 = scmp.lt.s32.totalorder %s1560_s23, %s1560_s23 }
  0x2a   :  { %p1567_p3 = por %p1566_p2, %p1565_p1 }
  0x2c   :  { %p1568_p4 = pnand %p1567_p3, %p1561_p0 }
  0x2e   :  { %1478 = vmatmul.mubr.msk.bf16.gmra.mrb[20].mxu0 %vm248_vm1, %v1550_v24  ;;  %1510 = vmatmul.mubr.msk.bf16.gmra.mrb[20].mxu1 %vm248_vm1, %v1551_v25 }
  0x2f   :  { %1481 = vmatprep.mubr.msk.bf16.mxu0 %vm248_vm1, %v1552_v26  ;;  %1513 = vmatprep.mubr.msk.bf16.mxu1 %vm248_vm1, %v1553_v27 }
  0x36   :  { %1482 = vmatmul.mubr.msk.bf16.gmra.mrb[24].mxu0 %vm248_vm1, %v1554_v28  ;;  %1514 = vmatmul.mubr.msk.bf16.gmra.mrb[24].mxu1 %vm248_vm1, %v1555_v29 }
  0x37   :  { %1485 = vmatprep.mubr.msk.bf16.mxu0 %vm248_vm1, %v1556_v30  ;;  %1517 = vmatprep.mubr.msk.bf16.mxu1 %vm248_vm1, %v1557_v31 }
  0x3e   :  { %1486 = vmatmul.mubr.msk.bf16.gmra.mrb[28].mxu0 %vm248_vm1, %v1558_v32  ;;  %1518 = vmatmul.mubr.msk.bf16.gmra.mrb[28].mxu1 %vm248_vm1, %v1559_v33 }
  0xd9   :  { %v1459_v35 = vpop.f32.mrb[0].mxu0  ;;  %v1491_v37 = vpop.f32.mrb[0].mxu1 }
  0xda   :  { %v392_v36 = vadd.f32 %v1459_v35, %v1741_v34  ;;  %v383_v38 = vpop.f32.mrb[1].mxu0  ;;  %v520_v39 = vadd.f32 %v1491_v37, %v1741_v34  ;;  %v511_v41 = vpop.f32.mrb[1].mxu1 }
  0xdb   :  { %v384_v40 = vadd.f32 %v1741_v34, %v383_v38  ;;  %v1460_v42 = vpop.f32.mrb[2].mxu0  ;;  %v512_v43 = vadd.f32 %v1741_v34, %v511_v41  ;;  %v1492_v45 = vpop.f32.mrb[2].mxu1 }
  0xdc   :  { %v395_v44 = vadd.f32 %v1460_v42, %v1741_v34  ;;  %v386_v46 = vpop.f32.mrb[3].mxu0  ;;  %v523_v47 = vadd.f32 %v1492_v45, %v1741_v34  ;;  %v514_v49 = vpop.f32.mrb[3].mxu1  ;;  %v640_v50 = vmax.f32 %v392_v36, 0.0  ;;  %v672_v53 = vmax.f32 %v520_v39, 0.0 }
  0xdd   :  { %v387_v48 = vadd.f32 %v1741_v34, %v386_v46  ;;  %v515_v52 = vadd.f32 %v1741_v34, %v514_v49  ;;  %v638_v54 = vmax.f32 %v384_v40, 0.0  ;;  %v670_v57 = vmax.f32 %v512_v43, 0.0 }
  0xde   :  { %v641_v51 = vmax.f32 %v395_v44, 0.0  ;;  %v673_v55 = vmax.f32 %v523_v47, 0.0 }
  0xdf   :  { %v639_v56 = vmax.f32 %v387_v48, 0.0  ;;  %v671_v59 = vmax.f32 %v515_v52, 0.0 }
  0xe0   :  { %v1239_v58 = vpack.c.bf16 %v641_v51, %v640_v50  ;;  %v1319_v60 = vpack.c.bf16 %v673_v55, %v672_v53 }
  0xe1   :  { %v1234_v61 = vpack.c.bf16 %v639_v56, %v638_v54  ;;  %v1463_v62 = vpop.f32.mrb[4].mxu0  ;;  %v1314_v63 = vpack.c.bf16 %v671_v59, %v670_v57  ;;  %v1495_v1 = vpop.f32.mrb[4].mxu1 }
  0xe2   :  { %1391 = vst [vmem:[#allocation2 + $0x8] sm:$0xff] %v1239_v58   ;;  %v408_v0 = vadd.f32 %v1463_v62, %v1741_v34  ;;  %v399_v2 = vpop.f32.mrb[5].mxu0  ;;  %1407 = vst [vmem:[#allocation2 + $0x88] sm:$0xff] %v1319_v60   ;;  %v536_v3 = vadd.f32 %v1495_v1, %v1741_v34  ;;  %v527_v5 = vpop.f32.mrb[5].mxu1 }
  0xe3   :  { %1235 = vst [vmem:[#allocation2] sm:$0xff] %v1234_v61   ;;  %v400_v4 = vadd.f32 %v1741_v34, %v399_v2  ;;  %v1464_v6 = vpop.f32.mrb[6].mxu0  ;;  %1406 = vst [vmem:[#allocation2 + $0x80] sm:$0xff] %v1314_v63   ;;  %v528_v7 = vadd.f32 %v1741_v34, %v527_v5  ;;  %v1496_v9 = vpop.f32.mrb[6].mxu1 }
  0xe4   :  { %v411_v8 = vadd.f32 %v1464_v6, %v1741_v34  ;;  %v402_v10 = vpop.f32.mrb[7].mxu0  ;;  %v539_v11 = vadd.f32 %v1496_v9, %v1741_v34  ;;  %v530_v13 = vpop.f32.mrb[7].mxu1  ;;  %v644_v14 = vmax.f32 %v408_v0, 0.0  ;;  %v676_v17 = vmax.f32 %v536_v3, 0.0 }
  0xe5   :  { %v403_v12 = vadd.f32 %v1741_v34, %v402_v10  ;;  %v531_v16 = vadd.f32 %v1741_v34, %v530_v13  ;;  %v642_v18 = vmax.f32 %v400_v4, 0.0  ;;  %v674_v21 = vmax.f32 %v528_v7, 0.0 }
  0xe6   :  { %v645_v15 = vmax.f32 %v411_v8, 0.0  ;;  %v677_v19 = vmax.f32 %v539_v11, 0.0 }
  0xe7   :  { %v643_v20 = vmax.f32 %v403_v12, 0.0  ;;  %v675_v23 = vmax.f32 %v531_v16, 0.0 }
  0xe8   :  { %v1249_v22 = vpack.c.bf16 %v645_v15, %v644_v14  ;;  %v1329_v24 = vpack.c.bf16 %v677_v19, %v676_v17 }
  0xe9   :  { %v1244_v25 = vpack.c.bf16 %v643_v20, %v642_v18  ;;  %v1467_v26 = vpop.f32.mrb[8].mxu0  ;;  %v1324_v27 = vpack.c.bf16 %v675_v23, %v674_v21  ;;  %v1499_v29 = vpop.f32.mrb[8].mxu1 }
  0xea   :  { %1393 = vst [vmem:[#allocation2 + $0x18] sm:$0xff] %v1249_v22   ;;  %v424_v28 = vadd.f32 %v1467_v26, %v1741_v34  ;;  %v415_v30 = vpop.f32.mrb[9].mxu0  ;;  %1409 = vst [vmem:[#allocation2 + $0x98] sm:$0xff] %v1329_v24   ;;  %v552_v31 = vadd.f32 %v1499_v29, %v1741_v34  ;;  %v543_v33 = vpop.f32.mrb[9].mxu1 }
  0xeb   :  { %1392 = vst [vmem:[#allocation2 + $0x10] sm:$0xff] %v1244_v25   ;;  %v416_v32 = vadd.f32 %v1741_v34, %v415_v30  ;;  %v1468_v35 = vpop.f32.mrb[10].mxu0  ;;  %1408 = vst [vmem:[#allocation2 + $0x90] sm:$0xff] %v1324_v27   ;;  %v544_v36 = vadd.f32 %v1741_v34, %v543_v33  ;;  %v1500_v38 = vpop.f32.mrb[10].mxu1 }
  0xec   :  { %v427_v37 = vadd.f32 %v1468_v35, %v1741_v34  ;;  %v418_v39 = vpop.f32.mrb[11].mxu0  ;;  %v555_v40 = vadd.f32 %v1500_v38, %v1741_v34  ;;  %v546_v42 = vpop.f32.mrb[11].mxu1  ;;  %v648_v43 = vmax.f32 %v424_v28, 0.0  ;;  %v680_v46 = vmax.f32 %v552_v31, 0.0 }
  0xed   :  { %v419_v41 = vadd.f32 %v1741_v34, %v418_v39  ;;  %v547_v45 = vadd.f32 %v1741_v34, %v546_v42  ;;  %v646_v47 = vmax.f32 %v416_v32, 0.0  ;;  %v678_v50 = vmax.f32 %v544_v36, 0.0 }
  0xee   :  { %v649_v44 = vmax.f32 %v427_v37, 0.0  ;;  %v681_v48 = vmax.f32 %v555_v40, 0.0 }
  0xef   :  { %v647_v49 = vmax.f32 %v419_v41, 0.0  ;;  %v679_v52 = vmax.f32 %v547_v45, 0.0 }
  0xf0   :  { %v1259_v51 = vpack.c.bf16 %v649_v44, %v648_v43  ;;  %v1339_v53 = vpack.c.bf16 %v681_v48, %v680_v46 }
  0xf1   :  { %v1254_v54 = vpack.c.bf16 %v647_v49, %v646_v47  ;;  %v1471_v55 = vpop.f32.mrb[12].mxu0  ;;  %v1334_v56 = vpack.c.bf16 %v679_v52, %v678_v50  ;;  %v1503_v58 = vpop.f32.mrb[12].mxu1 }
  0xf2   :  { %1395 = vst [vmem:[#allocation2 + $0x28] sm:$0xff] %v1259_v51   ;;  %v440_v57 = vadd.f32 %v1471_v55, %v1741_v34  ;;  %v431_v59 = vpop.f32.mrb[13].mxu0  ;;  %1411 = vst [vmem:[#allocation2 + $0xa8] sm:$0xff] %v1339_v53   ;;  %v568_v60 = vadd.f32 %v1503_v58, %v1741_v34  ;;  %v559_v62 = vpop.f32.mrb[13].mxu1 }
  0xf3   :  { %1394 = vst [vmem:[#allocation2 + $0x20] sm:$0xff] %v1254_v54   ;;  %v432_v61 = vadd.f32 %v1741_v34, %v431_v59  ;;  %v1472_v63 = vpop.f32.mrb[14].mxu0  ;;  %1410 = vst [vmem:[#allocation2 + $0xa0] sm:$0xff] %v1334_v56   ;;  %v560_v0 = vadd.f32 %v1741_v34, %v559_v62  ;;  %v1504_v2 = vpop.f32.mrb[14].mxu1 }
  0xf4   :  { %v443_v1 = vadd.f32 %v1472_v63, %v1741_v34  ;;  %v434_v3 = vpop.f32.mrb[15].mxu0  ;;  %v571_v4 = vadd.f32 %v1504_v2, %v1741_v34  ;;  %v562_v6 = vpop.f32.mrb[15].mxu1  ;;  %v652_v7 = vmax.f32 %v440_v57, 0.0  ;;  %v684_v10 = vmax.f32 %v568_v60, 0.0 }
  0xf5   :  { %v435_v5 = vadd.f32 %v1741_v34, %v434_v3  ;;  %v563_v9 = vadd.f32 %v1741_v34, %v562_v6  ;;  %v650_v11 = vmax.f32 %v432_v61, 0.0  ;;  %v682_v14 = vmax.f32 %v560_v0, 0.0 }
  0xf6   :  { %v653_v8 = vmax.f32 %v443_v1, 0.0  ;;  %v685_v12 = vmax.f32 %v571_v4, 0.0 }
  0xf7   :  { %v651_v13 = vmax.f32 %v435_v5, 0.0  ;;  %v683_v16 = vmax.f32 %v563_v9, 0.0 }
  0xf8   :  { %v1269_v15 = vpack.c.bf16 %v653_v8, %v652_v7  ;;  %v1349_v17 = vpack.c.bf16 %v685_v12, %v684_v10 }
  0xf9   :  { %v1264_v18 = vpack.c.bf16 %v651_v13, %v650_v11  ;;  %v1475_v19 = vpop.f32.mrb[16].mxu0  ;;  %v1344_v20 = vpack.c.bf16 %v683_v16, %v682_v14  ;;  %v1507_v22 = vpop.f32.mrb[16].mxu1 }
  0xfa   :  { %1397 = vst [vmem:[#allocation2 + $0x38] sm:$0xff] %v1269_v15   ;;  %v456_v21 = vadd.f32 %v1475_v19, %v1741_v34  ;;  %v447_v23 = vpop.f32.mrb[17].mxu0  ;;  %1413 = vst [vmem:[#allocation2 + $0xb8] sm:$0xff] %v1349_v17   ;;  %v584_v24 = vadd.f32 %v1507_v22, %v1741_v34  ;;  %v575_v26 = vpop.f32.mrb[17].mxu1 }
  0xfb   :  { %1396 = vst [vmem:[#allocation2 + $0x30] sm:$0xff] %v1264_v18   ;;  %v448_v25 = vadd.f32 %v1741_v34, %v447_v23  ;;  %v1476_v27 = vpop.f32.mrb[18].mxu0  ;;  %1412 = vst [vmem:[#allocation2 + $0xb0] sm:$0xff] %v1344_v20   ;;  %v576_v28 = vadd.f32 %v1741_v34, %v575_v26  ;;  %v1508_v30 = vpop.f32.mrb[18].mxu1 }
  0xfc   :  { %v459_v29 = vadd.f32 %v1476_v27, %v1741_v34  ;;  %v450_v31 = vpop.f32.mrb[19].mxu0  ;;  %v587_v32 = vadd.f32 %v1508_v30, %v1741_v34  ;;  %v578_v35 = vpop.f32.mrb[19].mxu1  ;;  %v656_v36 = vmax.f32 %v456_v21, 0.0  ;;  %v688_v39 = vmax.f32 %v584_v24, 0.0 }
  0xfd   :  { %v451_v33 = vadd.f32 %v1741_v34, %v450_v31  ;;  %v579_v38 = vadd.f32 %v1741_v34, %v578_v35  ;;  %v654_v40 = vmax.f32 %v448_v25, 0.0  ;;  %v686_v43 = vmax.f32 %v576_v28, 0.0 }
  0xfe   :  { %v657_v37 = vmax.f32 %v459_v29, 0.0  ;;  %v689_v41 = vmax.f32 %v587_v32, 0.0 }
  0xff   :  { %v655_v42 = vmax.f32 %v451_v33, 0.0  ;;  %v687_v45 = vmax.f32 %v579_v38, 0.0 }
 0x100   :  { %v1279_v44 = vpack.c.bf16 %v657_v37, %v656_v36  ;;  %v1359_v46 = vpack.c.bf16 %v689_v41, %v688_v39 }
 0x101   :  { %v1274_v47 = vpack.c.bf16 %v655_v42, %v654_v40  ;;  %v1479_v48 = vpop.f32.mrb[20].mxu0  ;;  %v1354_v49 = vpack.c.bf16 %v687_v45, %v686_v43  ;;  %v1511_v51 = vpop.f32.mrb[20].mxu1 }
 0x102   :  { %1399 = vst [vmem:[#allocation2 + $0x48] sm:$0xff] %v1279_v44   ;;  %v472_v50 = vadd.f32 %v1479_v48, %v1741_v34  ;;  %v463_v52 = vpop.f32.mrb[21].mxu0  ;;  %1415 = vst [vmem:[#allocation2 + $0xc8] sm:$0xff] %v1359_v46   ;;  %v600_v53 = vadd.f32 %v1511_v51, %v1741_v34  ;;  %v591_v55 = vpop.f32.mrb[21].mxu1 }
 0x103   :  { %1398 = vst [vmem:[#allocation2 + $0x40] sm:$0xff] %v1274_v47   ;;  %v464_v54 = vadd.f32 %v1741_v34, %v463_v52  ;;  %v1480_v56 = vpop.f32.mrb[22].mxu0  ;;  %1414 = vst [vmem:[#allocation2 + $0xc0] sm:$0xff] %v1354_v49   ;;  %v592_v57 = vadd.f32 %v1741_v34, %v591_v55  ;;  %v1512_v59 = vpop.f32.mrb[22].mxu1 }
 0x104   :  { %v475_v58 = vadd.f32 %v1480_v56, %v1741_v34  ;;  %v466_v60 = vpop.f32.mrb[23].mxu0  ;;  %v603_v61 = vadd.f32 %v1512_v59, %v1741_v34  ;;  %v594_v63 = vpop.f32.mrb[23].mxu1  ;;  %v660_v0 = vmax.f32 %v472_v50, 0.0  ;;  %v692_v3 = vmax.f32 %v600_v53, 0.0 }
 0x105   :  { %v467_v62 = vadd.f32 %v1741_v34, %v466_v60  ;;  %v595_v2 = vadd.f32 %v1741_v34, %v594_v63  ;;  %v658_v4 = vmax.f32 %v464_v54, 0.0  ;;  %v690_v7 = vmax.f32 %v592_v57, 0.0 }
 0x106   :  { %v661_v1 = vmax.f32 %v475_v58, 0.0  ;;  %v693_v5 = vmax.f32 %v603_v61, 0.0 }
 0x107   :  { %v659_v6 = vmax.f32 %v467_v62, 0.0  ;;  %v691_v9 = vmax.f32 %v595_v2, 0.0 }
 0x108   :  { %v1289_v8 = vpack.c.bf16 %v661_v1, %v660_v0  ;;  %v1369_v10 = vpack.c.bf16 %v693_v5, %v692_v3 }
 0x109   :  { %v1284_v11 = vpack.c.bf16 %v659_v6, %v658_v4  ;;  %v1483_v12 = vpop.f32.mrb[24].mxu0  ;;  %v1364_v13 = vpack.c.bf16 %v691_v9, %v690_v7  ;;  %v1515_v15 = vpop.f32.mrb[24].mxu1 }
 0x10a   :  { %1401 = vst [vmem:[#allocation2 + $0x58] sm:$0xff] %v1289_v8   ;;  %v488_v14 = vadd.f32 %v1483_v12, %v1741_v34  ;;  %v479_v16 = vpop.f32.mrb[25].mxu0  ;;  %1417 = vst [vmem:[#allocation2 + $0xd8] sm:$0xff] %v1369_v10   ;;  %v616_v17 = vadd.f32 %v1515_v15, %v1741_v34  ;;  %v607_v19 = vpop.f32.mrb[25].mxu1 }
 0x10b   :  { %1400 = vst [vmem:[#allocation2 + $0x50] sm:$0xff] %v1284_v11   ;;  %v480_v18 = vadd.f32 %v1741_v34, %v479_v16  ;;  %v1484_v20 = vpop.f32.mrb[26].mxu0  ;;  %1416 = vst [vmem:[#allocation2 + $0xd0] sm:$0xff] %v1364_v13   ;;  %v608_v21 = vadd.f32 %v1741_v34, %v607_v19  ;;  %v1516_v23 = vpop.f32.mrb[26].mxu1 }
 0x10c   :  { %v491_v22 = vadd.f32 %v1484_v20, %v1741_v34  ;;  %v482_v24 = vpop.f32.mrb[27].mxu0  ;;  %v619_v25 = vadd.f32 %v1516_v23, %v1741_v34  ;;  %v610_v27 = vpop.f32.mrb[27].mxu1  ;;  %v664_v28 = vmax.f32 %v488_v14, 0.0  ;;  %v696_v31 = vmax.f32 %v616_v17, 0.0 }
 0x10d   :  { %v483_v26 = vadd.f32 %v1741_v34, %v482_v24  ;;  %v611_v30 = vadd.f32 %v1741_v34, %v610_v27  ;;  %v662_v32 = vmax.f32 %v480_v18, 0.0  ;;  %v694_v36 = vmax.f32 %v608_v21, 0.0 }
 0x10e   :  { %v665_v29 = vmax.f32 %v491_v22, 0.0  ;;  %v697_v33 = vmax.f32 %v619_v25, 0.0 }
 0x10f   :  { %v663_v35 = vmax.f32 %v483_v26, 0.0  ;;  %v695_v38 = vmax.f32 %v611_v30, 0.0 }
 0x110   :  { %v1299_v37 = vpack.c.bf16 %v665_v29, %v664_v28  ;;  %v1379_v39 = vpack.c.bf16 %v697_v33, %v696_v31 }
 0x111   :  { %v1294_v40 = vpack.c.bf16 %v663_v35, %v662_v32  ;;  %v1487_v41 = vpop.f32.mrb[28].mxu0  ;;  %v1374_v42 = vpack.c.bf16 %v695_v38, %v694_v36  ;;  %v1519_v44 = vpop.f32.mrb[28].mxu1 }
 0x112   :  { %1403 = vst [vmem:[#allocation2 + $0x68] sm:$0xff] %v1299_v37   ;;  %v504_v43 = vadd.f32 %v1487_v41, %v1741_v34  ;;  %v495_v45 = vpop.f32.mrb[29].mxu0  ;;  %1419 = vst [vmem:[#allocation2 + $0xe8] sm:$0xff] %v1379_v39   ;;  %v632_v46 = vadd.f32 %v1519_v44, %v1741_v34  ;;  %v623_v48 = vpop.f32.mrb[29].mxu1 }
 0x113   :  { %1402 = vst [vmem:[#allocation2 + $0x60] sm:$0xff] %v1294_v40   ;;  %v496_v47 = vadd.f32 %v1741_v34, %v495_v45  ;;  %v1488_v49 = vpop.f32.mrb[30].mxu0  ;;  %1418 = vst [vmem:[#allocation2 + $0xe0] sm:$0xff] %v1374_v42   ;;  %v624_v50 = vadd.f32 %v1741_v34, %v623_v48  ;;  %v1520_v52 = vpop.f32.mrb[30].mxu1 }
 0x114   :  { %v507_v51 = vadd.f32 %v1488_v49, %v1741_v34  ;;  %v498_v53 = vpop.f32.mrb[31].mxu0  ;;  %v635_v54 = vadd.f32 %v1520_v52, %v1741_v34  ;;  %v626_v56 = vpop.f32.mrb[31].mxu1  ;;  %v668_v57 = vmax.f32 %v504_v43, 0.0  ;;  %v700_v60 = vmax.f32 %v632_v46, 0.0 }
 0x115   :  { %v499_v55 = vadd.f32 %v1741_v34, %v498_v53  ;;  %v627_v59 = vadd.f32 %v1741_v34, %v626_v56  ;;  %v666_v61 = vmax.f32 %v496_v47, 0.0  ;;  %v698_v0 = vmax.f32 %v624_v50, 0.0 }
 0x116   :  { %v669_v58 = vmax.f32 %v507_v51, 0.0  ;;  %v701_v62 = vmax.f32 %v635_v54, 0.0 }
 0x117   :  { %v667_v63 = vmax.f32 %v499_v55, 0.0  ;;  %v699_v2 = vmax.f32 %v627_v59, 0.0 }
 0x118   :  { %v1309_v1 = vpack.c.bf16 %v669_v58, %v668_v57  ;;  %v1389_v3 = vpack.c.bf16 %v701_v62, %v700_v60 }
 0x119   :  { %v1304_v4 = vpack.c.bf16 %v667_v63, %v666_v61  ;;  %v1384_v5 = vpack.c.bf16 %v699_v2, %v698_v0 }
 0x11a   :  { %1405 = vst [vmem:[#allocation2 + $0x78] sm:$0xff] %v1309_v1   ;;  %1421 = vst [vmem:[#allocation2 + $0xf8] sm:$0xff] %v1389_v3  }
 0x11b   :  { %1404 = vst [vmem:[#allocation2 + $0x70] sm:$0xff] %v1304_v4   ;;  %1420 = vst [vmem:[#allocation2 + $0xf0] sm:$0xff] %v1384_v5  }
 0x11c   :  { %1571 = shalt.err (!%p1568_p4)
}
 0x11d   :  { %s1572_s26 = scalar_lea.hbm %s1822_s3, 4096 }
 0x11e   :  { %p1573_p5 = scmp.ne.s32.totalorder %s1822_s3, %s1572_s26  ;;  %p1576_p6 = scmp.lt.u32.totalorder %s1572_s26, %s1822_s3 }
 0x120   :  { %p1578_p7 = pnand %p1576_p6, %p1573_p5 }
 0x122   :  { %1581 = shalt.err (!%p1578_p7)
}
 0x123   :  { %s1585_s4 = smov 64   ;;  %s1586_s5 = smov 4  }
 0x124   :  { %1033 = dma.vmem_to_hbm [thread:$0]  %s1028_s2, 4096, %s1822_s3, [#allocation3], %s1585_s4, %s1585_s4, %s1586_s5  }
 0x125   :  { %1582 = dma.done.wait [#allocation3], 4096  }
 0x126   :  { %1583 = vsyncadd [#allocation3], 4294963200 }
 0x127   :  { %1037 = vsyncpa [#allocation3], 1 }

</bundles_post_ra>
